<compile_context>
chip_gen: v7x
topology: tpu7x:2x2x1
jax: 0.10.0
libtpu: 0.0.40
codegen_flags: <defaults>
</compile_context>

<pallas_src>
import functools

import jax
import jax.numpy as jnp
from jax.experimental import pallas as pl
from jax.experimental.pallas import tpu as pltpu

LN_EPS = 1e-5


def _round_up(x, m):
    return (x + m - 1) // m * m


def actor_kernel(obs_ref,
                 w1_ref, b1_ref, g_ref, be_ref,   # linear1 + layernorm params
                 w2_ref, b2_ref,
                 w3_ref, b3_ref,
                 mu_ref):
    """One batch tile: Linear -> LayerNorm -> Tanh -> Linear -> ReLU -> Linear -> Tanh."""
    # --- Linear 1 (obs -> hidden): bf16 operands, f32 MXU accumulation ---
    h = jnp.dot(obs_ref[...], w1_ref[...],
                preferred_element_type=jnp.float32) + b1_ref[...]

    # --- LayerNorm over the true hidden dim (no padding -> no masking needed) ---
    mean = jnp.mean(h, axis=-1, keepdims=True)
    centered = h - mean
    var = jnp.mean(centered * centered, axis=-1, keepdims=True)
    h = centered * jax.lax.rsqrt(var + LN_EPS) * g_ref[...] + be_ref[...]

    # --- Tanh ---
    h = jnp.tanh(h)

    # --- Linear 2 (hidden -> hidden) + ReLU ---
    h = jnp.dot(h.astype(jnp.bfloat16), w2_ref[...],
                preferred_element_type=jnp.float32) + b2_ref[...]
    h = jnp.maximum(h, 0.0)

    # --- Linear 3 (hidden -> action) + final tanh squash ---
    mu = jnp.dot(h.astype(jnp.bfloat16), w3_ref[...],
                 preferred_element_type=jnp.float32) + b3_ref[...]
    mu_ref[...] = jnp.tanh(mu).astype(mu_ref.dtype)
    # TODO(synk): TruncatedNormal distribution object (sampling / log_prob) has
    # no Pallas equivalent; the kernel produces the distribution's mu parameter.


def prepare_params(params):
    """One-time parameter prep: bf16 weights, f32 (1, dim) biases / LN params.

    Call once at init; do NOT re-run per forward call.
    """
    as2d = lambda x: jnp.asarray(x).reshape(1, -1).astype(jnp.float32)
    return {
        "w1": jnp.asarray(params["w1"], jnp.bfloat16),
        "b1": as2d(params["b1"]),
        "ln_g": as2d(params["ln_g"]),
        "ln_b": as2d(params["ln_b"]),
        "w2": jnp.asarray(params["w2"], jnp.bfloat16),
        "b2": as2d(params["b2"]),
        "w3": jnp.asarray(params["w3"], jnp.bfloat16),
        "b3": as2d(params["b3"]),
    }


def _pick_batch_tile(B, tile_b):
    """Big tiles (amortize per-step overhead), >=2 grid steps when the batch
    allows it (so v7x can shard the batch across its 2 TensorCores), rows a
    multiple of 16 (bf16 sublane packing)."""
    B8 = _round_up(B, 8)
    if B8 <= 16:
        return B8                                   # one tile covers the tiny batch
    half = max(16, _round_up(pl.cdiv(B8, 2), 16))   # guarantees grid >= 2
    return max(16, min(_round_up(tile_b, 16), half))


def actor_forward(obs, prep, std_scalar, *, tile_b=1024):
    """Fused Actor MLP. Returns (mu, std), each (B, action_dim) float32."""
    B, obs_dim = obs.shape
    hidden = prep["w1"].shape[1]
    action_dim = prep["w3"].shape[1]

    tb = _pick_batch_tile(B, tile_b)
    B_P = _round_up(B, tb)

    # obs -> bf16 (halves the dominant HBM input stream; fuses with upstream
    # producers under jit).  Only the batch dim is padded, and only if needed;
    # feature dims keep their true sizes so DMAs stay contiguous full rows.
    obs_bf16 = obs.astype(jnp.bfloat16)
    if B_P != B:
        obs_bf16 = jnp.zeros((B_P, obs_dim), jnp.bfloat16).at[:B].set(obs_bf16)

    grid = (B_P // tb,)

    def resident(shape):
        # Block index never changes -> DMA'd once, stays resident in VMEM.
        return pl.BlockSpec(shape, lambda i: (0, 0))

    mu_p = pl.pallas_call(
        actor_kernel,
        out_shape=jax.ShapeDtypeStruct((B_P, action_dim), jnp.float32),
        grid=grid,
        in_specs=[
            pl.BlockSpec((tb, obs_dim), lambda i: (i, 0)),   # obs: tiled over batch
            resident((obs_dim, hidden)), resident((1, hidden)),
            resident((1, hidden)), resident((1, hidden)),
            resident((hidden, hidden)), resident((1, hidden)),
            resident((hidden, action_dim)), resident((1, action_dim)),
        ],
        out_specs=pl.BlockSpec((tb, action_dim), lambda i: (i, 0)),
        compiler_params=pltpu.CompilerParams(
            dimension_semantics=("parallel",),      # shard batch over v7x's 2 TCs
            vmem_limit_bytes=32 * 1024 * 1024,      # safe on v7x (64 MiB physical)
        ),
    )(obs_bf16, prep["w1"], prep["b1"], prep["ln_g"], prep["ln_b"],
      prep["w2"], prep["b2"], prep["w3"], prep["b3"])

    mu = mu_p if B_P == B else mu_p[:B]
    # std = ones_like(mu) * std -- constant broadcast, produced outside the kernel.
    std = jnp.full((B, action_dim), std_scalar, jnp.float32)
    return mu, std


def init_params(key, obs_dim, action_dim, hidden_dim):
    k1, k2, k3 = jax.random.split(key, 3)
    scale1 = 1.0 / jnp.sqrt(obs_dim)
    scale2 = 1.0 / jnp.sqrt(hidden_dim)
    return {
        # stored as (in, out): forward computes x @ W + b
        "w1": jax.random.uniform(k1, (obs_dim, hidden_dim), jnp.float32, -scale1, scale1),
        "b1": jnp.zeros((1, hidden_dim), jnp.float32),
        "ln_g": jnp.ones((1, hidden_dim), jnp.float32),   # LayerNorm default weight
        "ln_b": jnp.zeros((1, hidden_dim), jnp.float32),  # LayerNorm default bias
        "w2": jax.random.uniform(k2, (hidden_dim, hidden_dim), jnp.float32, -scale2, scale2),
        "b2": jnp.zeros((1, hidden_dim), jnp.float32),
        "w3": jax.random.uniform(k3, (hidden_dim, action_dim), jnp.float32, -scale2, scale2),
        "b3": jnp.zeros((1, action_dim), jnp.float32),
    }


def actor_reference(obs, params, std_scalar, *, bf16_matmul=False):
    """Pure-JAX reference. bf16_matmul=True mirrors the kernel's MXU precision."""
    def mm(x, w):
        if bf16_matmul:
            return jnp.dot(x.astype(jnp.bfloat16), w.astype(jnp.bfloat16),
                           preferred_element_type=jnp.float32)
        return jnp.dot(x, w)

    h = mm(obs, params["w1"]) + params["b1"]
    mean = h.mean(-1, keepdims=True)
    var = ((h - mean) ** 2).mean(-1, keepdims=True)
    h = (h - mean) / jnp.sqrt(var + LN_EPS) * params["ln_g"] + params["ln_b"]
    h = jnp.tanh(h)
    h = jnp.maximum(mm(h, params["w2"]) + params["b2"], 0.0)
    mu = jnp.tanh(mm(h, params["w3"]) + params["b3"])
    std = jnp.ones_like(mu) * std_scalar
    return mu, std


if __name__ == "__main__":
    B, OBS_DIM, ACTION_DIM, HIDDEN_DIM = 8, 24, 6, 64
    STD = 0.2

    key = jax.random.PRNGKey(0)
    kobs, kparams, kobs2 = jax.random.split(key, 3)
    obs = jax.random.normal(kobs, (B, OBS_DIM), jnp.float32)
    params = init_params(kparams, OBS_DIM, ACTION_DIM, HIDDEN_DIM)
    prep = prepare_params(params)          # one-time weight prep (bf16 cast)

    fwd = jax.jit(actor_forward, static_argnames=("tile_b",))

    # --- small batch: single tile covers the whole batch, grid=(1,) ---
    mu, std = fwd(obs, prep, STD)
    jax.block_until_ready((mu, std))

    mu_bf16, _ = actor_reference(obs, params, STD, bf16_matmul=True)
    mu_f32, std_ref = actor_reference(obs, params, STD, bf16_matmul=False)
    assert mu.shape == (B, ACTION_DIM) and std.shape == (B, ACTION_DIM)
    # Tight check vs a reference with matching (bf16 matmul, f32 accum) precision.
    assert jnp.allclose(mu, mu_bf16, atol=2e-3, rtol=2e-3), \
        float(jnp.max(jnp.abs(mu - mu_bf16)))
    # Loose check vs the full-f32 reference (documents bf16 matmul fidelity).
    assert jnp.allclose(mu, mu_f32, atol=5e-2, rtol=5e-2)
    assert jnp.allclose(std, std_ref, atol=1e-6)

    # --- larger batch, default tiling: exercises batch padding + grid >= 2 ---
    B2 = 200
    obs2 = jax.random.normal(kobs2, (B2, OBS_DIM), jnp.float32)
    mu2, std2 = fwd(obs2, prep, STD)
    jax.block_until_ready((mu2, std2))
    mu2_bf16, _ = actor_reference(obs2, params, STD, bf16_matmul=True)
    assert mu2.shape == (B2, ACTION_DIM) and std2.shape == (B2, ACTION_DIM)
    assert jnp.allclose(mu2, mu2_bf16, atol=2e-3, rtol=2e-3)

    # --- explicit small tile: exercises a longer grid (4 steps) ---
    mu3, _ = fwd(obs2, prep, STD, tile_b=64)
    jax.block_until_ready(mu3)
    assert jnp.allclose(mu3, mu2_bf16, atol=2e-3, rtol=2e-3)

    print("KERNEL_OK")
</pallas_src>

<mosaic_0001>
module attributes {stable_mosaic.version = 11 : i64} {
  func.func @actor_kernel(%arg0: i32, %arg1: memref<8x24xbf16, #tpu.memory_space<vmem>>, %arg2: memref<24x64xbf16, #tpu.memory_space<vmem>>, %arg3: memref<1x64xf32, #tpu.memory_space<vmem>>, %arg4: memref<1x64xf32, #tpu.memory_space<vmem>>, %arg5: memref<1x64xf32, #tpu.memory_space<vmem>>, %arg6: memref<64x64xbf16, #tpu.memory_space<vmem>>, %arg7: memref<1x64xf32, #tpu.memory_space<vmem>>, %arg8: memref<64x6xbf16, #tpu.memory_space<vmem>>, %arg9: memref<1x6xf32, #tpu.memory_space<vmem>>, %arg10: memref<8x6xf32, #tpu.memory_space<vmem>>) attributes {dimension_semantics = [#tpu.dimension_semantics<parallel>], iteration_bounds = array<i64: 1>, scalar_prefetch = 0 : i64, scratch_operands = 0 : i64, tpu.core_type = #tpu.core_type<tc>, window_params = [{transform_indices = @transform_0, window_bounds = array<i64: 8, 24>}, {pipeline_mode = #tpu.pipeline_mode<synchronous>, transform_indices = @transform_1, window_bounds = array<i64: 24, 64>}, {pipeline_mode = #tpu.pipeline_mode<synchronous>, transform_indices = @transform_2, window_bounds = array<i64: 1, 64>}, {pipeline_mode = #tpu.pipeline_mode<synchronous>, transform_indices = @transform_3, window_bounds = array<i64: 1, 64>}, {pipeline_mode = #tpu.pipeline_mode<synchronous>, transform_indices = @transform_4, window_bounds = array<i64: 1, 64>}, {pipeline_mode = #tpu.pipeline_mode<synchronous>, transform_indices = @transform_5, window_bounds = array<i64: 64, 64>}, {pipeline_mode = #tpu.pipeline_mode<synchronous>, transform_indices = @transform_6, window_bounds = array<i64: 1, 64>}, {pipeline_mode = #tpu.pipeline_mode<synchronous>, transform_indices = @transform_7, window_bounds = array<i64: 64, 6>}, {pipeline_mode = #tpu.pipeline_mode<synchronous>, transform_indices = @transform_8, window_bounds = array<i64: 1, 6>}, {transform_indices = @transform_9, window_bounds = array<i64: 8, 6>}]} {
    %c0 = arith.constant 0 : index
    %c0_0 = arith.constant 0 : index
    %0 = vector.load %arg1[%c0, %c0_0] : memref<8x24xbf16, #tpu.memory_space<vmem>>, vector<8x24xbf16>
    %c0_1 = arith.constant 0 : index
    %c0_2 = arith.constant 0 : index
    %1 = vector.load %arg2[%c0_1, %c0_2] : memref<24x64xbf16, #tpu.memory_space<vmem>>, vector<24x64xbf16>
    %cst = arith.constant dense<0.000000e+00> : vector<8x64xf32>
    %2 = tpu.matmul %0, %1, %cst {dimension_numbers = #tpu.dot_dimension_numbers<[1], [0], [0], [1], [0, 0, 1, 1], [], []>} : vector<8x24xbf16>, vector<24x64xbf16>, vector<8x64xf32> -> vector<8x64xf32>
    %c0_3 = arith.constant 0 : index
    %c0_4 = arith.constant 0 : index
    %3 = vector.load %arg3[%c0_3, %c0_4] : memref<1x64xf32, #tpu.memory_space<vmem>>, vector<1x64xf32>
    %4 = vector.broadcast %3 : vector<1x64xf32> to vector<8x64xf32>
    %5 = arith.addf %2, %4 : vector<8x64xf32>
    %cst_5 = arith.constant dense<0.000000e+00> : vector<8xf32>
    %6 = vector.multi_reduction <add>, %5, %cst_5 [1] : vector<8x64xf32> to vector<8xf32>
    %7 = vector.shape_cast %6 : vector<8xf32> to vector<8x1xf32>
    %cst_6 = arith.constant 6.400000e+01 : f32
    %8 = vector.broadcast %cst_6 : f32 to vector<8x1xf32>
    %9 = arith.divf %7, %8 : vector<8x1xf32>
    %10 = vector.broadcast %9 : vector<8x1xf32> to vector<8x64xf32>
    %11 = arith.subf %5, %10 : vector<8x64xf32>
    %12 = arith.mulf %11, %11 : vector<8x64xf32>
    %cst_7 = arith.constant dense<0.000000e+00> : vector<8xf32>
    %13 = vector.multi_reduction <add>, %12, %cst_7 [1] : vector<8x64xf32> to vector<8xf32>
    %14 = vector.shape_cast %13 : vector<8xf32> to vector<8x1xf32>
    %cst_8 = arith.constant 6.400000e+01 : f32
    %15 = vector.broadcast %cst_8 : f32 to vector<8x1xf32>
    %16 = arith.divf %14, %15 : vector<8x1xf32>
    %cst_9 = arith.constant 9.99999974E-6 : f32
    %17 = vector.broadcast %cst_9 : f32 to vector<8x1xf32>
    %18 = arith.addf %16, %17 : vector<8x1xf32>
    %19 = math.rsqrt %18 : vector<8x1xf32>
    %20 = vector.broadcast %19 : vector<8x1xf32> to vector<8x64xf32>
    %21 = arith.mulf %11, %20 : vector<8x64xf32>
    %c0_10 = arith.constant 0 : index
    %c0_11 = arith.constant 0 : index
    %22 = vector.load %arg4[%c0_10, %c0_11] : memref<1x64xf32, #tpu.memory_space<vmem>>, vector<1x64xf32>
    %23 = vector.broadcast %22 : vector<1x64xf32> to vector<8x64xf32>
    %24 = arith.mulf %21, %23 : vector<8x64xf32>
    %c0_12 = arith.constant 0 : index
    %c0_13 = arith.constant 0 : index
    %25 = vector.load %arg5[%c0_12, %c0_13] : memref<1x64xf32, #tpu.memory_space<vmem>>, vector<1x64xf32>
    %26 = vector.broadcast %25 : vector<1x64xf32> to vector<8x64xf32>
    %27 = arith.addf %24, %26 : vector<8x64xf32>
    %28 = math.tanh %27 : vector<8x64xf32>
    %29 = arith.truncf %28 : vector<8x64xf32> to vector<8x64xbf16>
    %c0_14 = arith.constant 0 : index
    %c0_15 = arith.constant 0 : index
    %30 = vector.load %arg6[%c0_14, %c0_15] : memref<64x64xbf16, #tpu.memory_space<vmem>>, vector<64x64xbf16>
    %cst_16 = arith.constant dense<0.000000e+00> : vector<8x64xf32>
    %31 = tpu.matmul %29, %30, %cst_16 {dimension_numbers = #tpu.dot_dimension_numbers<[1], [0], [0], [1], [0, 0, 1, 1], [], []>} : vector<8x64xbf16>, vector<64x64xbf16>, vector<8x64xf32> -> vector<8x64xf32>
    %c0_17 = arith.constant 0 : index
    %c0_18 = arith.constant 0 : index
    %32 = vector.load %arg7[%c0_17, %c0_18] : memref<1x64xf32, #tpu.memory_space<vmem>>, vector<1x64xf32>
    %33 = vector.broadcast %32 : vector<1x64xf32> to vector<8x64xf32>
    %34 = arith.addf %31, %33 : vector<8x64xf32>
    %cst_19 = arith.constant 0.000000e+00 : f32
    %35 = vector.broadcast %cst_19 : f32 to vector<8x64xf32>
    %36 = arith.maximumf %34, %35 : vector<8x64xf32>
    %37 = arith.truncf %36 : vector<8x64xf32> to vector<8x64xbf16>
    %c0_20 = arith.constant 0 : index
    %c0_21 = arith.constant 0 : index
    %38 = vector.load %arg8[%c0_20, %c0_21] : memref<64x6xbf16, #tpu.memory_space<vmem>>, vector<64x6xbf16>
    %cst_22 = arith.constant dense<0.000000e+00> : vector<8x6xf32>
    %39 = tpu.matmul %37, %38, %cst_22 {dimension_numbers = #tpu.dot_dimension_numbers<[1], [0], [0], [1], [0, 0, 1, 1], [], []>} : vector<8x64xbf16>, vector<64x6xbf16>, vector<8x6xf32> -> vector<8x6xf32>
    %c0_23 = arith.constant 0 : index
    %c0_24 = arith.constant 0 : index
    %40 = vector.load %arg9[%c0_23, %c0_24] : memref<1x6xf32, #tpu.memory_space<vmem>>, vector<1x6xf32>
    %41 = vector.broadcast %40 : vector<1x6xf32> to vector<8x6xf32>
    %42 = arith.addf %39, %41 : vector<8x6xf32>
    %43 = math.tanh %42 : vector<8x6xf32>
    %c0_25 = arith.constant 0 : index
    %c0_26 = arith.constant 0 : index
    %44 = vector.load %arg10[%c0_25, %c0_26] : memref<8x6xf32, #tpu.memory_space<vmem>>, vector<8x6xf32>
    tpu.vector_store %arg10[%c0_25, %c0_26], %43 {strides = array<i32>} : memref<8x6xf32, #tpu.memory_space<vmem>>, vector<8x6xf32>,
    return
  }
  func.func @transform_0(%arg0: i32) -> (i32, i32) {
    %c0_i32 = arith.constant 0 : i32
    %c0_i32_0 = arith.constant 0 : i32
    return %arg0, %c0_i32 : i32, i32
  }
  func.func @transform_1(%arg0: i32) -> (i32, i32) {
    %c0_i32 = arith.constant 0 : i32
    %c0_i32_0 = arith.constant 0 : i32
    %c0_i32_1 = arith.constant 0 : i32
    return %c0_i32, %c0_i32_0 : i32, i32
  }
  func.func @transform_2(%arg0: i32) -> (i32, i32) {
    %c0_i32 = arith.constant 0 : i32
    %c0_i32_0 = arith.constant 0 : i32
    %c0_i32_1 = arith.constant 0 : i32
    return %c0_i32, %c0_i32_0 : i32, i32
  }
  func.func @transform_3(%arg0: i32) -> (i32, i32) {
    %c0_i32 = arith.constant 0 : i32
    %c0_i32_0 = arith.constant 0 : i32
    %c0_i32_1 = arith.constant 0 : i32
    return %c0_i32, %c0_i32_0 : i32, i32
  }
  func.func @transform_4(%arg0: i32) -> (i32, i32) {
    %c0_i32 = arith.constant 0 : i32
    %c0_i32_0 = arith.constant 0 : i32
    %c0_i32_1 = arith.constant 0 : i32
    return %c0_i32, %c0_i32_0 : i32, i32
  }
  func.func @transform_5(%arg0: i32) -> (i32, i32) {
    %c0_i32 = arith.constant 0 : i32
    %c0_i32_0 = arith.constant 0 : i32
    %c0_i32_1 = arith.constant 0 : i32
    return %c0_i32, %c0_i32_0 : i32, i32
  }
  func.func @transform_6(%arg0: i32) -> (i32, i32) {
    %c0_i32 = arith.constant 0 : i32
    %c0_i32_0 = arith.constant 0 : i32
    %c0_i32_1 = arith.constant 0 : i32
    return %c0_i32, %c0_i32_0 : i32, i32
  }
  func.func @transform_7(%arg0: i32) -> (i32, i32) {
    %c0_i32 = arith.constant 0 : i32
    %c0_i32_0 = arith.constant 0 : i32
    %c0_i32_1 = arith.constant 0 : i32
    return %c0_i32, %c0_i32_0 : i32, i32
  }
  func.func @transform_8(%arg0: i32) -> (i32, i32) {
    %c0_i32 = arith.constant 0 : i32
    %c0_i32_0 = arith.constant 0 : i32
    %c0_i32_1 = arith.constant 0 : i32
    return %c0_i32, %c0_i32_0 : i32, i32
  }
  func.func @transform_9(%arg0: i32) -> (i32, i32) {
    %c0_i32 = arith.constant 0 : i32
    %c0_i32_0 = arith.constant 0 : i32
    return %arg0, %c0_i32 : i32, i32
  }
}

</mosaic_0001>

<bundles_post_ra>
// kernel: actor_forward.1
= control target key start
LH: loop header
LB: loop body
LE: loop exit
PB: predicated region body
PF: predicated region fallthrough
CT: control target
= control target key end

     0   :  { %v424_v1 = vmov 0.0   ;;  %vm58_vm0 = vcmask 1043456   ;;  %vm425_vm1 = vmmov 0   ;;  %vm54_vm2 = vcmask 195584   ;;  %s554_s0 = inlined_call_operand.vmem [shape: bf16[8,24], index: 0, kind: input, shape index: {}]   ;;  %s555_s1 = inlined_call_operand.vmem [shape: bf16[24,64], index: 1, kind: input, shape index: {}]   ;;  %s556_s2 = inlined_call_operand.vmem [shape: f32[1,64], index: 2, kind: input, shape index: {}]   ;;  %s557_s3 = inlined_call_operand.vmem [shape: f32[1,64], index: 3, kind: input, shape index: {}]   ;;  %s558_s4 = inlined_call_operand.vmem [shape: f32[1,64], index: 4, kind: input, shape index: {}]   ;;  %s559_s5 = inlined_call_operand.vmem [shape: bf16[64,64], index: 5, kind: input, shape index: {}]   ;;  %s560_s6 = inlined_call_operand.vmem [shape: f32[1,64], index: 6, kind: input, shape index: {}]   ;;  %s561_s7 = inlined_call_operand.vmem [shape: bf16[64,6], index: 7, kind: input, shape index: {}]   ;;  %s562_s8 = inlined_call_operand.vmem [shape: f32[1,6], index: 8, kind: input, shape index: {}]   ;;  %s563_s9 = inlined_call_operand.hbm [shape: f32[8,6], index: 9, kind: output, shape index: {}]  }
   0x1   :  { %v384_v0 = vld [vmem:[%s555_s1] sm:$0xff]   ;;  %349 = vmatprep.subr.bf16.mxu0 %v424_v1  ;;  %v385_v2 = vld [vmem:[%s555_s1 + $0x8] ss:$0 sps:$4 sm:$0xff]   ;;  %357 = vmatprep.subr.bf16.mxu1 %v424_v1 }
   0x2   :  { %350 = vmatpush3.bf16.msra.mxu0 %v384_v0  ;;  %353 = vmatprep.mubr.msk.bf16.mxu0 %vm425_vm1, %v424_v1  ;;  %v60_v3 = vsel %vm58_vm0, %v385_v2, 0  ;;  %v34_v4 = vld [vmem:[%s554_s0] sm:$0xf] }
   0x3   :  { %351 = vmatprep.subr.bf16.mxu0 %v424_v1  ;;  %365 = vmatprep.mubr.msk.bf16.mxu1 %vm425_vm1, %v424_v1 }
   0x6   :  { %352 = vmatpush3.bf16.msra.mxu0 %v60_v3 }
   0x7   :  { %369 = vmatprep.subr.bf16.mxu0 %v424_v1 }
   0x8   :  { %14 = vsyncpa [#allocation3], 0  ;;  %v318_v5 = vld [vmem:[%s556_s2] ss:$0 sm:$0xff]  ;;  %vm102_vm3 = vcmask 523264   ;;  %v387_v18 = vld [vmem:[%s559_s5 + $0x8] sm:$0xff]  }
   0x9   :  { %354 = vmatmul.mubr.msk.bf16.vlgmr.msra.gmra.mrb[0].mxu0 %vm54_vm2, %v34_v4  ;;  %v386_v17 = vld [vmem:[%s559_s5] sm:$0xff]   ;;  %v388_v19 = vld [vmem:[%s559_s5 + $0x10] sm:$0xff]   ;;  %v389_v20 = vld [vmem:[%s559_s5 + $0x18] sm:$0xff]   ;;  %vm302_vm4 = vcmask 48128  }
   0xa   :  { %377 = vmatprep.mubr.msk.bf16.mxu0 %vm425_vm1, %v424_v1  ;;  %358 = vmatpush3.bf16.msra.mxu1 %v386_v17  ;;  %v390_v21 = vld [vmem:[%s561_s7] sm:$0xff]   ;;  %v391_v22 = vld [vmem:[%s561_s7 + $0x8] sm:$0xff]   ;;  %v392_v34 = vld [vmem:[%s561_s7 + $0x10] sm:$0xff]  }
   0xb   :  { %359 = vmatprep.subr.bf16.mxu1 %v424_v1  ;;  %370 = vmatpush3.bf16.msra.mxu0 %v390_v21  ;;  %v322_v27 = vld [vmem:[%s557_s3] ss:$0 sm:$0xff]  ;;  %v393_v35 = vld [vmem:[%s561_s7 + $0x18] sm:$0xff]  }
   0xc   :  { %371 = vmatprep.subr.bf16.mxu0 %v424_v1  ;;  %v323_v29 = vld [vmem:[%s558_s4] ss:$0 sm:$0xff] }
   0xd   :  { %v324_v36 = vld [vmem:[%s560_s6] ss:$0 sm:$0xff]  ;;  %s426_s6 = smov [#allocation2]  }
   0xe   :  { %360 = vmatpush3.bf16.msra.mxu1 %v387_v18  ;;  %v330_v44 = vld [vmem:[%s562_s8] ss:$0 sm:$0xff]  ;;  %s310_s7 = sshll.u32 %s426_s6, 4  ;;  %s311_s7 = int_to_ptr.vmem [resolvable:$true] %s310_s7 }
   0xf   :  { %361 = vmatprep.subr.bf16.mxu1 %v424_v1  ;;  %372 = vmatpush3.bf16.msra.mxu0 %v391_v22  ;;  %s400_s14 = scalar_lea.vmem %s311_s7, 128  ;;  %p405_p1 = scmp.lt.s32.totalorder %s311_s7, %s311_s7 }
  0x10   :  { %373 = vmatprep.subr.bf16.mxu0 %v424_v1  ;;  %p401_p0 = scmp.ne.s32.totalorder %s311_s7, %s400_s14  ;;  %p406_p2 = scmp.lt.s32.totalorder %s400_s14, %s400_s14 }
  0x12   :  { %362 = vmatpush3.bf16.msra.mxu1 %v388_v19  ;;  %p407_p3 = por %p406_p2, %p405_p1 }
  0x13   :  { %363 = vmatprep.subr.bf16.mxu1 %v424_v1  ;;  %374 = vmatpush3.bf16.msra.mxu0 %v392_v34 }
  0x14   :  { %375 = vmatprep.subr.bf16.mxu0 %v424_v1  ;;  %p408_p4 = pnand %p407_p3, %p401_p0 }
  0x16   :  { %364 = vmatpush3.bf16.msra.mxu1 %v389_v20 }
  0x17   :  { %376 = vmatpush3.bf16.msra.mxu0 %v393_v35 }
  0xdc   :  { %v96_v6 = vpop.f32.mrb[0].mxu0 }
  0xdd   :  { %v97_v7 = vadd.f32 %v318_v5, %v96_v6  ;;  %v355_v8 = vpop.f32.mrb[1].mxu0 }
  0xde   :  { %v99_v9 = vpop.f32.mrb[2].mxu0 }
  0xdf   :  { %v356_v10 = vpop.f32.mrb[3].mxu0  ;;  %v103_v11 = vsel %vm102_vm3, %v97_v7, 0.0 }
  0xe0   :  { %104 = vadd.xlane.f32.xlu0 %v103_v11 }
 0x16d   :  { %v105_v12 = vpop.xlane.xlu0 %104 }
 0x16e   :  { %v107_v13 = vmul.f32 0.015625, %v105_v12 }
 0x170   :  { %v108_v14 = vsub.f32 %v97_v7, %v107_v13 }
 0x172   :  { %v109_v15 = vmul.f32 %v108_v14, %v108_v14 }
 0x174   :  { %v110_v16 = vsel %vm102_vm3, %v109_v15, 0.0 }
 0x175   :  { %111 = vadd.xlane.f32.xlu0 %v110_v16 }
 0x202   :  { %v112_v23 = vpop.xlane.xlu0 %111 }
 0x203   :  { %v113_v24 = vmul.f32 0.015625, %v112_v23 }
 0x205   :  { %v114_v25 = vadd.f32 1e-05, %v113_v24 }
 0x207   :  { %394 = vrsqrt.f32 %v114_v25 }
 0x211   :  { %v395_v26 = vpop.eup %394 }
 0x212   :  { %v116_v28 = vmul.f32 %v395_v26, %v108_v14 }
 0x214   :  { %v124_v30 = vmul.f32 %v322_v27, %v116_v28 }
 0x216   :  { %v132_v31 = vadd.f32 %v323_v29, %v124_v30 }
 0x218   :  { %396 = vtanh.f32 %v132_v31 }
 0x222   :  { %v397_v32 = vpop.eup %396 }
 0x223   :  { %v134_v33 = vpack.c.bf16 %v397_v32, %v397_v32 }
 0x225   :  { %366 = vmatmul.mubr.msk.bf16.vlgmr.msra.gmra.mrb[0].mxu1 %vm102_vm3, %v134_v33 }
 0x2f8   :  { %v211_v37 = vpop.f32.mrb[0].mxu1 }
 0x2f9   :  { %v212_v38 = vadd.f32 %v324_v36, %v211_v37  ;;  %v367_v39 = vpop.f32.mrb[1].mxu1 }
 0x2fa   :  { %v214_v40 = vpop.f32.mrb[2].mxu1 }
 0x2fb   :  { %v217_v41 = vmax.f32 %v212_v38, 0.0  ;;  %v368_v42 = vpop.f32.mrb[3].mxu1 }
 0x2fd   :  { %v218_v43 = vpack.c.bf16 %v217_v41, %v217_v41 }
 0x2ff   :  { %378 = vmatmul.mubr.msk.bf16.vlgmr.msra.gmra.mrb[4].mxu0 %vm102_vm3, %v218_v43 }
 0x3d2   :  { %v295_v45 = vpop.f32.mrb[4].mxu0 }
 0x3d3   :  { %v296_v46 = vadd.f32 %v330_v44, %v295_v45  ;;  %v379_v47 = vpop.f32.mrb[5].mxu0 }
 0x3d4   :  { %v298_v48 = vpop.f32.mrb[6].mxu0 }
 0x3d5   :  { %398 = vtanh.f32 %v296_v46  ;;  %v380_v49 = vpop.f32.mrb[7].mxu0 }
 0x3df   :  { %v399_v50 = vpop.eup %398 }
 0x3e0   :  { %303 = vst.msk [vmem:[#allocation2] sm:$0xff] %vm302_vm4, %v399_v50 }
 0x3e1   :  { %411 = shalt.err (!%p408_p4)
}
 0x3e2   :  { %s412_s15 = scalar_lea.hbm %s563_s9, 128 }
 0x3e3   :  { %p413_p5 = scmp.ne.s32.totalorder %s563_s9, %s412_s15  ;;  %p416_p6 = scmp.lt.u32.totalorder %s412_s15, %s563_s9 }
 0x3e5   :  { %p418_p7 = pnand %p416_p6, %p413_p5 }
 0x3e7   :  { %421 = shalt.err (!%p418_p7)
}
 0x3e8   :  { %313 = dma.vmem_to_hbm [thread:$0]  %s311_s7, 128, %s563_s9, [#allocation3]  }
 0x3e9   :  { %422 = dma.done.wait [#allocation3], 128  }
 0x3ea   :  { %423 = vsyncadd [#allocation3], 4294967168 }
 0x3eb   :  { %317 = vsyncpa [#allocation3], 1 }

</bundles_post_ra>
